<compile_context>
chip_gen: v6e
topology: v6e:2x2x1
jax: 0.10.0
libtpu: 0.0.40
codegen_flags: <defaults>
</compile_context>

<pallas_src>
import functools

import jax
import jax.numpy as jnp
from jax.experimental import pallas as pl
from jax.experimental.pallas import tpu as pltpu

LANE = 128
SUBLANE = 8
ALIGN = LANE * SUBLANE            # 1024: tiles must be (8,128)-aligned for dense slabs
MAX_TILE = 512 * 1024             # 512K lanes -> ~36 MiB double-buffered (fits v7x 64 MiB/TC)


def _round_up(a, m):
    return ((a + m - 1) // m) * m


def _cdiv(a, b):
    return -(-a // b)


def _acrobot_constants(m1=1.0, m2=1.0, l1=1.0, l2=2.0, lc1=0.5, lc2=1.0,
                       Ic1=0.083, Ic2=0.33, b1=0.1, b2=0.1, gravity=9.81):
    I1 = Ic1 + m1 * lc1 * lc1
    I2 = Ic2 + m2 * lc2 * lc2
    m2l1lc2 = m2 * l1 * lc2
    det_M_minimal = (Ic1 * Ic2 + Ic1 * m2 * lc2 ** 2 + Ic2 * m1 * lc1 ** 2
                     + Ic2 * m2 * l1 ** 2 + m1 * m2 * lc1 ** 2 * lc2 ** 2)
    return dict(
        I2=I2,
        m2l1lc2=m2l1lc2,
        M00_const=I1 + I2 + m2 * l1 * l1,               # constant part of M00
        g_s1=gravity * m1 * lc1 + gravity * m2 * l1,    # coefficient of sin(th1)
        g_s12=gravity * m2 * lc2,                       # coefficient of sin(th1+th2)
        b1=b1, b2=b2,
        det_M_minimal=det_M_minimal,
    )


def _acrobot_kernel(x_ref, u_ref, o_ref, *, c):
    # x_ref: (4, S, 128) rows = [th1, th2, thd1, thd2]; u_ref: (1, S, 128); o_ref: (4, S, 128).
    # Each component is a fully (sublane, lane)-dense (S, 128) slab.
    th1 = x_ref[0]
    th2 = x_ref[1]
    v1 = x_ref[2]
    v2 = x_ref[3]
    u = u_ref[0]

    # Transcendentals go to the EUP; everything else is dense VPU work.
    c2 = jnp.cos(th2)
    s1 = jnp.sin(th1)
    s2 = jnp.sin(th2)
    s12 = jnp.sin(th1 + th2)

    m12 = c["I2"] + c["m2l1lc2"] * c2                    # M01 == M10
    M00 = c["M00_const"] + 2.0 * c["m2l1lc2"] * c2
    M11 = c["I2"]                                        # compile-time scalar

    # Hoist k = m2*l1*lc2*sin(th2); factor the velocity terms of the bias.
    k = c["m2l1lc2"] * s2
    bias0 = (-k) * v2 * (2.0 * v1 + v2) \
        + c["g_s1"] * s1 + c["g_s12"] * s12 \
        + c["b1"] * v1
    bias1 = k * (v1 * v1) + c["g_s12"] * s12 + c["b2"] * v2

    rhs0 = -bias0
    rhs1 = u - bias1

    det_M = jnp.maximum(M00 * M11 - m12 * m12 - c["det_M_minimal"], 0.0) \
        + c["det_M_minimal"]
    # Exact reciprocal keeps the 1e-5 tolerance; kernel is HBM-bound so EUP has slack.
    inv_det = 1.0 / det_M

    # Per-row, fully dense slab stores.
    o_ref[0] = v1
    o_ref[1] = v2
    o_ref[2] = (M11 * rhs0 - m12 * rhs1) * inv_det
    o_ref[3] = (-m12 * rhs0 + M00 * rhs1) * inv_det


def acrobot_dynamics_pallas(x, u, *, batch_tile=128 * 1024):
    """x: (B, 4), u: (B, 1) -> (B, 4), matching AcrobotDynamics.forward."""
    assert x.shape[0] == u.shape[0]
    B = x.shape[0]
    orig_dtype = x.dtype

    xf = x.astype(jnp.float32)
    uf = u.astype(jnp.float32)

    # --- tile / grid selection ------------------------------------------------
    Bp = _round_up(B, ALIGN)
    bt = _round_up(min(max(batch_tile, ALIGN), MAX_TILE), ALIGN)
    n_steps = _cdiv(Bp, bt)
    if n_steps == 1 and Bp >= 16 * ALIGN:
        # Large single-block batch: split into 2 parallel steps so both v7x
        # TensorCores get work (free when HBM-bound on v5e/v6e).
        n_steps = 2
    tile = _round_up(_cdiv(Bp, n_steps), ALIGN)           # minimizes padding waste
    Bp = tile * n_steps
    S_total = Bp // LANE
    S_tile = tile // LANE                                 # multiple of 8 by construction

    # --- one padded-transpose pass into SoA layout ----------------------------
    # TODO(synk): if the caller keeps state in SoA (4, B) layout end-to-end, this
    # transpose/pad pass (and the inverse one on the way out) disappears entirely.
    if Bp == B:
        xt = xf.T.reshape(4, S_total, LANE)
        ut = uf.T.reshape(1, S_total, LANE)
    else:
        xt = jnp.zeros((4, Bp), jnp.float32).at[:, :B].set(xf.T).reshape(4, S_total, LANE)
        ut = jnp.zeros((1, Bp), jnp.float32).at[:, :B].set(uf.T).reshape(1, S_total, LANE)

    c = _acrobot_constants()
    kernel = functools.partial(_acrobot_kernel, c=c)

    # Double-buffered VMEM footprint: 2 * (4 + 1 + 4) f32 rows per lane = 72 B/lane.
    vmem_bytes = 2 * (4 + 1 + 4) * 4 * tile + (4 << 20)
    vmem_bytes = min(max(vmem_bytes, 32 << 20), 48 << 20)  # <= 48 MiB (v7x headroom)

    out3 = pl.pallas_call(
        kernel,
        out_shape=jax.ShapeDtypeStruct((4, S_total, LANE), jnp.float32),
        grid_spec=pltpu.PrefetchScalarGridSpec(
            num_scalar_prefetch=0,
            grid=(n_steps,),
            in_specs=[
                pl.BlockSpec((4, S_tile, LANE), lambda i: (0, i, 0)),
                pl.BlockSpec((1, S_tile, LANE), lambda i: (0, i, 0)),
            ],
            out_specs=pl.BlockSpec((4, S_tile, LANE), lambda i: (0, i, 0)),
        ),
        compiler_params=pltpu.CompilerParams(
            dimension_semantics=("parallel",),
            vmem_limit_bytes=vmem_bytes),
    )(xt, ut)

    out = out3.reshape(4, Bp)[:, :B].T
    return out.astype(orig_dtype)


def acrobot_dynamics_ref(x, u):
    """Pure-JAX reference mirroring the PyTorch forward exactly."""
    m1, m2, l1, lc1, lc2 = 1.0, 1.0, 1.0, 0.5, 1.0
    Ic1, Ic2, b1, b2, gravity = 0.083, 0.33, 0.1, 0.1, 9.81
    det_M_minimal = (Ic1 * Ic2 + Ic1 * m2 * lc2 ** 2 + Ic2 * m1 * lc1 ** 2
                     + Ic2 * m2 * l1 ** 2 + m1 * m2 * lc1 ** 2 * lc2 ** 2)
    I1 = Ic1 + m1 * lc1 * lc1
    I2 = Ic2 + m2 * lc2 * lc2
    m2l1lc2 = m2 * l1 * lc2
    c2 = jnp.cos(x[:, 1])
    m12 = I2 + m2l1lc2 * c2
    M00 = I1 + I2 + m2 * l1 * l1 + 2.0 * m2l1lc2 * c2
    M01, M10, M11 = m12, m12, I2
    s1 = jnp.sin(x[:, 0])
    s2 = jnp.sin(x[:, 1])
    s12 = jnp.sin(x[:, 0] + x[:, 1])
    bias0 = -2.0 * m2l1lc2 * s2 * x[:, 3] * x[:, 2] + (-m2l1lc2) * s2 * x[:, 3] * x[:, 3]
    bias1 = m2l1lc2 * s2 * x[:, 2] * x[:, 2]
    bias0 = bias0 + gravity * m1 * lc1 * s1 + gravity * m2 * (l1 * s1 + lc2 * s12)
    bias1 = bias1 + gravity * m2 * lc2 * s12
    bias0 = bias0 + b1 * x[:, 2]
    bias1 = bias1 + b2 * x[:, 3]
    rhs0 = -bias0
    rhs1 = u[:, 0] - bias1
    det_M = jax.nn.relu(M00 * M11 - M01 * M10 - det_M_minimal) + det_M_minimal
    vdot0 = (M11 * rhs0 + (-M10) * rhs1) / det_M
    vdot1 = ((-M01) * rhs0 + M00 * rhs1) / det_M
    return jnp.concatenate([x[:, 2:], vdot0[:, None], vdot1[:, None]], axis=1)


if __name__ == "__main__":
    key = jax.random.PRNGKey(0)
    kx, ku = jax.random.split(key)

    # Small smoke test (B = 8, padded to one 1024-lane tile internally).
    B = 8
    x = jax.random.normal(kx, (B, 4), dtype=jnp.float32)
    u = jax.random.normal(ku, (B, 1), dtype=jnp.float32)
    out = jax.block_until_ready(acrobot_dynamics_pallas(x, u))
    ref = acrobot_dynamics_ref(x, u)
    assert out.shape == (B, 4)
    assert jnp.allclose(out, ref, atol=1e-5, rtol=1e-5), (out, ref)

    # Non-aligned batch with a multi-step grid (exercises padding + tiling).
    B2 = 1500
    x2 = jax.random.normal(kx, (B2, 4), dtype=jnp.float32)
    u2 = jax.random.normal(ku, (B2, 1), dtype=jnp.float32)
    out2 = jax.block_until_ready(acrobot_dynamics_pallas(x2, u2, batch_tile=1024))
    ref2 = acrobot_dynamics_ref(x2, u2)
    assert out2.shape == (B2, 4)
    assert jnp.allclose(out2, ref2, atol=1e-5, rtol=1e-5), (out2, ref2)

    print("KERNEL_OK")
</pallas_src>

<mosaic_0001>
module attributes {stable_mosaic.version = 11 : i64} {
  func.func @_acrobot_kernel(%arg0: i32, %arg1: memref<4x8x128xf32, #tpu.memory_space<vmem>>, %arg2: memref<1x8x128xf32, #tpu.memory_space<vmem>>, %arg3: memref<4x8x128xf32, #tpu.memory_space<vmem>>) attributes {dimension_semantics = [#tpu.dimension_semantics<parallel>], iteration_bounds = array<i64: 1>, scalar_prefetch = 0 : i64, scratch_operands = 0 : i64, tpu.core_type = #tpu.core_type<tc>, window_params = [{transform_indices = @transform_0, window_bounds = array<i64: 4, 8, 128>}, {transform_indices = @transform_1, window_bounds = array<i64: 1, 8, 128>}, {transform_indices = @transform_2, window_bounds = array<i64: 4, 8, 128>}]} {
    %c0 = arith.constant 0 : index
    %c0_0 = arith.constant 0 : index
    %c0_1 = arith.constant 0 : index
    %0 = vector.load %arg1[%c0, %c0_0, %c0_1] : memref<4x8x128xf32, #tpu.memory_space<vmem>>, vector<1x8x128xf32>
    %1 = vector.shape_cast %0 : vector<1x8x128xf32> to vector<8x128xf32>
    %c1 = arith.constant 1 : index
    %c0_2 = arith.constant 0 : index
    %c0_3 = arith.constant 0 : index
    %2 = vector.load %arg1[%c1, %c0_2, %c0_3] : memref<4x8x128xf32, #tpu.memory_space<vmem>>, vector<1x8x128xf32>
    %3 = vector.shape_cast %2 : vector<1x8x128xf32> to vector<8x128xf32>
    %c2 = arith.constant 2 : index
    %c0_4 = arith.constant 0 : index
    %c0_5 = arith.constant 0 : index
    %4 = vector.load %arg1[%c2, %c0_4, %c0_5] : memref<4x8x128xf32, #tpu.memory_space<vmem>>, vector<1x8x128xf32>
    %5 = vector.shape_cast %4 : vector<1x8x128xf32> to vector<8x128xf32>
    %c3 = arith.constant 3 : index
    %c0_6 = arith.constant 0 : index
    %c0_7 = arith.constant 0 : index
    %6 = vector.load %arg1[%c3, %c0_6, %c0_7] : memref<4x8x128xf32, #tpu.memory_space<vmem>>, vector<1x8x128xf32>
    %7 = vector.shape_cast %6 : vector<1x8x128xf32> to vector<8x128xf32>
    %c0_8 = arith.constant 0 : index
    %c0_9 = arith.constant 0 : index
    %c0_10 = arith.constant 0 : index
    %8 = vector.load %arg2[%c0_8, %c0_9, %c0_10] : memref<1x8x128xf32, #tpu.memory_space<vmem>>, vector<1x8x128xf32>
    %9 = vector.shape_cast %8 : vector<1x8x128xf32> to vector<8x128xf32>
    %10 = math.cos %3 : vector<8x128xf32>
    %11 = math.sin %1 : vector<8x128xf32>
    %12 = math.sin %3 : vector<8x128xf32>
    %13 = arith.addf %1, %3 : vector<8x128xf32>
    %14 = math.sin %13 : vector<8x128xf32>
    %cst = arith.constant 1.000000e+00 : f32
    %15 = vector.broadcast %cst : f32 to vector<8x128xf32>
    %16 = arith.mulf %15, %10 : vector<8x128xf32>
    %cst_11 = arith.constant 1.330000e+00 : f32
    %17 = vector.broadcast %cst_11 : f32 to vector<8x128xf32>
    %18 = arith.addf %17, %16 : vector<8x128xf32>
    %cst_12 = arith.constant 2.000000e+00 : f32
    %19 = vector.broadcast %cst_12 : f32 to vector<8x128xf32>
    %20 = arith.mulf %19, %10 : vector<8x128xf32>
    %cst_13 = arith.constant 2.663000e+00 : f32
    %21 = vector.broadcast %cst_13 : f32 to vector<8x128xf32>
    %22 = arith.addf %21, %20 : vector<8x128xf32>
    %cst_14 = arith.constant 1.000000e+00 : f32
    %23 = vector.broadcast %cst_14 : f32 to vector<8x128xf32>
    %24 = arith.mulf %23, %12 : vector<8x128xf32>
    %cst_15 = arith.constant 0.000000e+00 : f32
    %25 = vector.broadcast %cst_15 : f32 to vector<8x128xf32>
    %26 = arith.subf %25, %24 : vector<8x128xf32>
    %27 = arith.mulf %26, %7 : vector<8x128xf32>
    %cst_16 = arith.constant 2.000000e+00 : f32
    %28 = vector.broadcast %cst_16 : f32 to vector<8x128xf32>
    %29 = arith.mulf %28, %5 : vector<8x128xf32>
    %30 = arith.addf %29, %7 : vector<8x128xf32>
    %31 = arith.mulf %27, %30 : vector<8x128xf32>
    %cst_17 = arith.constant 1.471500e+01 : f32
    %32 = vector.broadcast %cst_17 : f32 to vector<8x128xf32>
    %33 = arith.mulf %32, %11 : vector<8x128xf32>
    %34 = arith.addf %31, %33 : vector<8x128xf32>
    %cst_18 = arith.constant 9.810000e+00 : f32
    %35 = vector.broadcast %cst_18 : f32 to vector<8x128xf32>
    %36 = arith.mulf %35, %14 : vector<8x128xf32>
    %37 = arith.addf %34, %36 : vector<8x128xf32>
    %cst_19 = arith.constant 1.000000e-01 : f32
    %38 = vector.broadcast %cst_19 : f32 to vector<8x128xf32>
    %39 = arith.mulf %38, %5 : vector<8x128xf32>
    %40 = arith.addf %37, %39 : vector<8x128xf32>
    %41 = arith.mulf %5, %5 : vector<8x128xf32>
    %42 = arith.mulf %24, %41 : vector<8x128xf32>
    %cst_20 = arith.constant 9.810000e+00 : f32
    %43 = vector.broadcast %cst_20 : f32 to vector<8x128xf32>
    %44 = arith.mulf %43, %14 : vector<8x128xf32>
    %45 = arith.addf %42, %44 : vector<8x128xf32>
    %cst_21 = arith.constant 1.000000e-01 : f32
    %46 = vector.broadcast %cst_21 : f32 to vector<8x128xf32>
    %47 = arith.mulf %46, %7 : vector<8x128xf32>
    %48 = arith.addf %45, %47 : vector<8x128xf32>
    %cst_22 = arith.constant 0.000000e+00 : f32
    %49 = vector.broadcast %cst_22 : f32 to vector<8x128xf32>
    %50 = arith.subf %49, %40 : vector<8x128xf32>
    %51 = arith.subf %9, %48 : vector<8x128xf32>
    %cst_23 = arith.constant 1.330000e+00 : f32
    %52 = vector.broadcast %cst_23 : f32 to vector<8x128xf32>
    %53 = arith.mulf %22, %52 : vector<8x128xf32>
    %54 = arith.mulf %18, %18 : vector<8x128xf32>
    %55 = arith.subf %53, %54 : vector<8x128xf32>
    %cst_24 = arith.constant 0.772889971 : f32
    %56 = vector.broadcast %cst_24 : f32 to vector<8x128xf32>
    %57 = arith.subf %55, %56 : vector<8x128xf32>
    %cst_25 = arith.constant 0.000000e+00 : f32
    %58 = vector.broadcast %cst_25 : f32 to vector<8x128xf32>
    %59 = arith.maximumf %57, %58 : vector<8x128xf32>
    %cst_26 = arith.constant 0.772889971 : f32
    %60 = vector.broadcast %cst_26 : f32 to vector<8x128xf32>
    %61 = arith.addf %59, %60 : vector<8x128xf32>
    %cst_27 = arith.constant 1.000000e+00 : f32
    %62 = vector.broadcast %cst_27 : f32 to vector<8x128xf32>
    %63 = arith.divf %62, %61 : vector<8x128xf32>
    %c0_28 = arith.constant 0 : index
    %c0_29 = arith.constant 0 : index
    %c0_30 = arith.constant 0 : index
    %64 = vector.load %arg3[%c0_28, %c0_29, %c0_30] : memref<4x8x128xf32, #tpu.memory_space<vmem>>, vector<1x8x128xf32>
    %65 = vector.shape_cast %64 : vector<1x8x128xf32> to vector<8x128xf32>
    %66 = vector.shape_cast %5 : vector<8x128xf32> to vector<1x8x128xf32>
    tpu.vector_store %arg3[%c0_28, %c0_29, %c0_30], %66 {strides = array<i32>} : memref<4x8x128xf32, #tpu.memory_space<vmem>>, vector<1x8x128xf32>,
    %c1_31 = arith.constant 1 : index
    %c0_32 = arith.constant 0 : index
    %c0_33 = arith.constant 0 : index
    %67 = vector.load %arg3[%c1_31, %c0_32, %c0_33] : memref<4x8x128xf32, #tpu.memory_space<vmem>>, vector<1x8x128xf32>
    %68 = vector.shape_cast %67 : vector<1x8x128xf32> to vector<8x128xf32>
    %69 = vector.shape_cast %7 : vector<8x128xf32> to vector<1x8x128xf32>
    tpu.vector_store %arg3[%c1_31, %c0_32, %c0_33], %69 {strides = array<i32>} : memref<4x8x128xf32, #tpu.memory_space<vmem>>, vector<1x8x128xf32>,
    %cst_34 = arith.constant 1.330000e+00 : f32
    %70 = vector.broadcast %cst_34 : f32 to vector<8x128xf32>
    %71 = arith.mulf %70, %50 : vector<8x128xf32>
    %72 = arith.mulf %18, %51 : vector<8x128xf32>
    %73 = arith.subf %71, %72 : vector<8x128xf32>
    %74 = arith.mulf %73, %63 : vector<8x128xf32>
    %c2_35 = arith.constant 2 : index
    %c0_36 = arith.constant 0 : index
    %c0_37 = arith.constant 0 : index
    %75 = vector.load %arg3[%c2_35, %c0_36, %c0_37] : memref<4x8x128xf32, #tpu.memory_space<vmem>>, vector<1x8x128xf32>
    %76 = vector.shape_cast %75 : vector<1x8x128xf32> to vector<8x128xf32>
    %77 = vector.shape_cast %74 : vector<8x128xf32> to vector<1x8x128xf32>
    tpu.vector_store %arg3[%c2_35, %c0_36, %c0_37], %77 {strides = array<i32>} : memref<4x8x128xf32, #tpu.memory_space<vmem>>, vector<1x8x128xf32>,
    %cst_38 = arith.constant 0.000000e+00 : f32
    %78 = vector.broadcast %cst_38 : f32 to vector<8x128xf32>
    %79 = arith.subf %78, %18 : vector<8x128xf32>
    %80 = arith.mulf %79, %50 : vector<8x128xf32>
    %81 = arith.mulf %22, %51 : vector<8x128xf32>
    %82 = arith.addf %80, %81 : vector<8x128xf32>
    %83 = arith.mulf %82, %63 : vector<8x128xf32>
    %c3_39 = arith.constant 3 : index
    %c0_40 = arith.constant 0 : index
    %c0_41 = arith.constant 0 : index
    %84 = vector.load %arg3[%c3_39, %c0_40, %c0_41] : memref<4x8x128xf32, #tpu.memory_space<vmem>>, vector<1x8x128xf32>
    %85 = vector.shape_cast %84 : vector<1x8x128xf32> to vector<8x128xf32>
    %86 = vector.shape_cast %83 : vector<8x128xf32> to vector<1x8x128xf32>
    tpu.vector_store %arg3[%c3_39, %c0_40, %c0_41], %86 {strides = array<i32>} : memref<4x8x128xf32, #tpu.memory_space<vmem>>, vector<1x8x128xf32>,
    return
  }
  func.func @transform_0(%arg0: i32) -> (i32, i32, i32) {
    %c0_i32 = arith.constant 0 : i32
    %c0_i32_0 = arith.constant 0 : i32
    %c0_i32_1 = arith.constant 0 : i32
    return %c0_i32, %arg0, %c0_i32_0 : i32, i32, i32
  }
  func.func @transform_1(%arg0: i32) -> (i32, i32, i32) {
    %c0_i32 = arith.constant 0 : i32
    %c0_i32_0 = arith.constant 0 : i32
    %c0_i32_1 = arith.constant 0 : i32
    return %c0_i32, %arg0, %c0_i32_0 : i32, i32, i32
  }
  func.func @transform_2(%arg0: i32) -> (i32, i32, i32) {
    %c0_i32 = arith.constant 0 : i32
    %c0_i32_0 = arith.constant 0 : i32
    %c0_i32_1 = arith.constant 0 : i32
    return %c0_i32, %arg0, %c0_i32_0 : i32, i32, i32
  }
}

</mosaic_0001>

<bundles_post_ra>
// kernel: tpu_custom_call.1
= control target key start
LH: loop header
LB: loop body
LE: loop exit
PB: predicated region body
PF: predicated region fallthrough
CT: control target
= control target key end

     0   :  { %7 = vsyncpa [#allocation3], 0  ;;  %s915_s0 = inlined_call_operand.hbm [shape: f32[4,8,128], index: 0, kind: input, shape index: {}]   ;;  %s916_s1 = inlined_call_operand.hbm [shape: f32[1,8,128], index: 1, kind: input, shape index: {}]   ;;  %s917_s2 = inlined_call_operand.hbm [shape: f32[4,8,128], index: 2, kind: output, shape index: {}]  }
   0x1   :  { %8 = vsyncpa [#allocation6], 0 }
   0x2   :  { %9 = vsyncpa [#allocation4], 0  ;;  %s645_s9 = smov [#allocation2]  }
   0x3   :  { %s15_s10 = sshll.u32 %s645_s9, 4  ;;  %s16_s10 = int_to_ptr.vmem [resolvable:$true] %s15_s10 }
   0x4   :  { %s587_s11 = scalar_lea.vmem %s16_s10, 512  ;;  %p592_p1 = scmp.lt.s32.totalorder %s16_s10, %s16_s10 }
   0x5   :  { %p588_p0 = scmp.ne.s32.totalorder %s16_s10, %s587_s11  ;;  %p593_p2 = scmp.lt.s32.totalorder %s587_s11, %s587_s11 }
   0x7   :  { %p594_p3 = por %p593_p2, %p592_p1 }
   0x9   :  { %p595_p4 = pnand %p594_p3, %p588_p0 }
   0xb   :  { %598 = shalt.err (!%p595_p4)
}
   0xc   :  { %s646_s12 = smov 128   ;;  %s647_s13 = smov 8  }
   0xd   :  { %21 = dma.hbm_to_vmem [thread:$0]  %s915_s0, 512, %s16_s10, [#allocation3], %s646_s12, %s646_s12, %s647_s13  }
   0xe   :  { %s648_s16 = smov [#allocation5]  }
   0xf   :  { %s28_s17 = sshll.u32 %s648_s16, 4  ;;  %s29_s17 = int_to_ptr.vmem [resolvable:$true] %s28_s17 }
  0x10   :  { %s607_s18 = scalar_lea.vmem %s29_s17, 128  ;;  %p612_p6 = scmp.lt.s32.totalorder %s29_s17, %s29_s17 }
  0x11   :  { %p608_p5 = scmp.ne.s32.totalorder %s29_s17, %s607_s18  ;;  %p613_p7 = scmp.lt.s32.totalorder %s607_s18, %s607_s18 }
  0x13   :  { %p614_p8 = por %p613_p7, %p612_p6 }
  0x15   :  { %p615_p9 = pnand %p614_p8, %p608_p5 }
  0x17   :  { %618 = shalt.err (!%p615_p9)
}
  0x18   :  { %31 = dma.hbm_to_vmem [thread:$0]  %s916_s1, 128, %s29_s17, [#allocation6]  }
  0x19   :  { %639 = dma.done.wait [#allocation3], 512  }
  0x1a   :  { %640 = vsyncadd [#allocation3], 4294966784 }
  0x1b   :  { %641 = dma.done.wait [#allocation6], 128  }
  0x1c   :  { %642 = vsyncadd [#allocation6], 4294967168  ;;  %v680_v0 = vld [vmem:[#allocation2 + $0x8] sm:$0xff]  ;;  %v682_v1 = vld [vmem:[#allocation2 + $0x10] sm:$0xff]  ;;  %v649_v26 = vmov 683565275  }
  0x1d   :  { %v46_v2 = vand.u32 2147483647, %v680_v0  ;;  %v49_v3 = vand.u32 2139095040, %v680_v0  ;;  %491 = vst [vmem:[#allocation7] sm:$0xff] %v682_v1  ;;  %v687_v4 = vld [vmem:[#allocation2] sm:$0xff]  ;;  %v689_v5 = vld [vmem:[#allocation2 + $0x18] sm:$0xff] }
  0x1e   :  { %v149_v6 = vand.u32 2147483647, %v687_v4  ;;  %493 = vst [vmem:[#allocation7 + $0x8] sm:$0xff] %v689_v5  ;;  %v152_v9 = vand.u32 2139095040, %v687_v4  ;;  %v700_v17 = vadd.f32 %v680_v0, %v687_v4  ;;  %v650_v28 = vmov 2475754826  }
  0x1f   :  { %v50_v7 = vshrl.u32 %v49_v3, 23  ;;  %v53_v8 = vand.u32 8388607, %v46_v2  ;;  %v651_v30 = vmov 2131351028   ;;  %s655_s0 = smov [#allocation7]  }
  0x20   :  { %v156_v10 = vand.u32 8388607, %v149_v6  ;;  %v153_v12 = vshrl.u32 %v152_v9, 23  ;;  %v361_v24 = vand.u32 2139095040, %v700_v17  ;;  %v652_v32 = vmov 2102212464  }
  0x21   :  { %v525_v11 = vadd.s32 4294967169, %v50_v7  ;;  %v54_v14 = vor.u32 8388608, %v53_v8  ;;  %v653_v34 = vmov 920167782   ;;  %v654_v41 = vmov 1326507024  }
  0x22   :  { %v529_v15 = vadd.s32 4294967169, %v153_v12  ;;  %v157_v16 = vor.u32 8388608, %v156_v10  ;;  %s512_s1 = sshll.u32 %s655_s0, 4  ;;  %s513_s1 = int_to_ptr.vmem [resolvable:$true] %s512_s1 }
  0x23   :  { %v56_v13 = vadd.s32 1, %v525_v11  ;;  %v702_v22 = vshll.u32 %v54_v14, 8  ;;  %s619_s21 = scalar_lea.vmem %s513_s1, 512  ;;  %p624_p11 = scmp.lt.s32.totalorder %s513_s1, %s513_s1 }
  0x24   :  { %v159_v19 = vadd.s32 1, %v529_v15  ;;  %v704_v23 = vshll.u32 %v157_v16, 8  ;;  %p620_p10 = scmp.ne.s32.totalorder %s513_s1, %s619_s21  ;;  %p625_p12 = scmp.lt.s32.totalorder %s619_s21, %s619_s21 }
  0x25   :  { %vm57_vm0 = vcmp.gt.s32.totalorder %v56_v13, 0 }
  0x26   :  { %v58_v18 = vsel %vm57_vm0, %v56_v13, 0  ;;  %vm160_vm1 = vcmp.gt.s32.totalorder %v159_v19, 0  ;;  %p626_p13 = por %p625_p12, %p624_p11 }
  0x27   :  { %v59_v20 = vshrl.u32 %v58_v18, 5  ;;  %v60_v21 = vand.u32 31, %v58_v18  ;;  %v161_v46 = vsel %vm160_vm1, %v159_v19, 0 }
  0x28   :  { %v162_v49 = vshrl.u32 %v161_v46, 5  ;;  %v163_v50 = vand.u32 31, %v161_v46  ;;  %p627_p0 = pnand %p626_p13, %p620_p10 }
  0x29   :  { %v61_v25 = vsub.s32 32, %v60_v21  ;;  %v63_v27 = vshll.u32 %v649_v26, %v60_v21  ;;  %v66_v29 = vshll.u32 %v650_v28, %v60_v21  ;;  %v69_v31 = vshll.u32 %v651_v30, %v60_v21 }
  0x2a   :  { %v72_v33 = vshll.u32 %v652_v32, %v60_v21  ;;  %v75_v35 = vshll.u32 %v653_v34, %v60_v21  ;;  %vm78_vm2 = vcmp.lt.s32.totalorder %v59_v20, 1  ;;  %vm79_vm3 = vcmp.lt.s32.totalorder %v59_v20, 2 }
  0x2b   :  { %v62_v36 = vshrl.u32 %v649_v26, %v61_v25  ;;  %v64_v37 = vshrl.u32 %v650_v28, %v61_v25  ;;  %v67_v38 = vshrl.u32 %v651_v30, %v61_v25  ;;  %v70_v39 = vshrl.u32 %v652_v32, %v61_v25 }
  0x2c   :  { %v73_v40 = vshrl.u32 %v653_v34, %v61_v25  ;;  %v76_v42 = vshrl.u32 %v654_v41, %v61_v25  ;;  %vm80_vm4 = vcmp.lt.s32.totalorder %v59_v20, 3  ;;  %vm81_vm5 = vcmp.lt.s32.totalorder %v59_v20, 4 }
  0x2d   :  { %v65_v43 = vor.u32 %v64_v37, %v63_v27  ;;  %v68_v44 = vor.u32 %v67_v38, %v66_v29  ;;  %v71_v45 = vor.u32 %v70_v39, %v69_v31  ;;  %v164_v58 = vsub.s32 32, %v163_v50 }
  0x2e   :  { %v74_v47 = vor.u32 %v73_v40, %v72_v33  ;;  %v77_v48 = vor.u32 %v76_v42, %v75_v35  ;;  %v166_v62 = vshll.u32 %v649_v26, %v163_v50  ;;  %v169_v14 = vshll.u32 %v650_v28, %v163_v50 }
  0x2f   :  { %v82_v51 = vsel %vm78_vm2, %v62_v36, %v65_v43  ;;  %v83_v52 = vsel %vm81_vm5, %v71_v45, 2102212464  ;;  %v86_v53 = vsel %vm78_vm2, %v65_v43, %v68_v44  ;;  %v90_v54 = vsel %vm78_vm2, %v68_v44, %v71_v45 }
  0x30   :  { %v84_v55 = vsel %vm80_vm4, %v68_v44, %v83_v52  ;;  %v87_v56 = vsel %vm81_vm5, %v74_v47, 920167782  ;;  %v91_v57 = vsel %vm81_vm5, %v77_v48, 1326507024  ;;  %v165_v8 = vshrl.u32 %v649_v26, %v164_v58 }
  0x31   :  { %v85_v59 = vsel %vm79_vm3, %v82_v51, %v84_v55  ;;  %v88_v60 = vsel %vm80_vm4, %v71_v45, %v87_v56  ;;  %v92_v61 = vsel %vm80_vm4, %v74_v47, %v91_v57  ;;  %v167_v13 = vshrl.u32 %v650_v28, %v164_v58 }
  0x32   :  { %v89_v63 = vsel %vm79_vm3, %v86_v53, %v88_v60  ;;  %v93_v3 = vsel %vm79_vm3, %v90_v54, %v92_v61  ;;  %v101_v7 = vmul.u32 %v702_v22, %v85_v59  ;;  %v170_v15 = vshrl.u32 %v651_v30, %v164_v58 }
  0x33   :  { %v732_v9 = vmul.u32.u64.low %v702_v22, %v93_v3  ;;  %v733_v10 = vmul.u32.u64.high %v702_v22, %v93_v3, %v732_v9  ;;  %v736_v11 = vmul.u32.u64.low %v702_v22, %v89_v63  ;;  %v737_v12 = vmul.u32.u64.high %v702_v22, %v89_v63, %v736_v11 }
  0x34   :  { %v172_v16 = vshll.u32 %v651_v30, %v163_v50  ;;  %v173_v18 = vshrl.u32 %v652_v32, %v164_v58  ;;  %v175_v19 = vshll.u32 %v652_v32, %v163_v50  ;;  %v176_v20 = vshrl.u32 %v653_v34, %v164_v58 }
  0x35   :  { %v178_v21 = vshll.u32 %v653_v34, %v163_v50  ;;  %v168_v25 = vor.u32 %v167_v13, %v166_v62  ;;  %v171_v22 = vor.u32 %v170_v15, %v169_v14  ;;  %v179_v27 = vshrl.u32 %v654_v41, %v164_v58 }
  0x36   :  { %vm181_vm6 = vcmp.lt.s32.totalorder %v162_v49, 1  ;;  %vm103_vm7 = vc.u32 %v733_v10, %v736_v11  ;;  %v104_v29 = vadd.s32 1, %v737_v12  ;;  %v174_v31 = vor.u32 %v173_v18, %v172_v16 }
  0x37   :  { %v362_v33 = vshrl.u32 %v361_v24, 23  ;;  %v177_v35 = vor.u32 %v176_v20, %v175_v19  ;;  %v180_v36 = vor.u32 %v179_v27, %v178_v21  ;;  %vm182_vm8 = vcmp.lt.s32.totalorder %v162_v49, 2 }
  0x38   :  { %vm183_vm9 = vcmp.lt.s32.totalorder %v162_v49, 3  ;;  %v105_v37 = vsel %vm103_vm7, %v104_v29, %v737_v12  ;;  %vm184_vm10 = vcmp.lt.s32.totalorder %v162_v49, 4  ;;  %v185_v38 = vsel %vm181_vm6, %v165_v8, %v168_v25 }
  0x39   :  { %v189_v39 = vsel %vm181_vm6, %v168_v25, %v171_v22  ;;  %v106_v40 = vadd.s32 %v105_v37, %v101_v7  ;;  %v186_v42 = vsel %vm184_vm10, %v174_v31, 2102212464  ;;  %v190_v43 = vsel %vm184_vm10, %v177_v35, 920167782 }
  0x3a   :  { %v193_v44 = vsel %vm181_vm6, %v171_v22, %v174_v31  ;;  %v187_v45 = vsel %vm183_vm9, %v171_v22, %v186_v42  ;;  %v191_v46 = vsel %vm183_vm9, %v174_v31, %v190_v43  ;;  %v194_v47 = vsel %vm184_vm10, %v180_v36, 1326507024 }
  0x3b   :  { %v537_v24 = vadd.s32 4294967169, %v362_v33  ;;  %v107_v48 = vadd.s32 536870912, %v106_v40  ;;  %v192_v50 = vsel %vm182_vm8, %v189_v39, %v191_v46  ;;  %v195_v51 = vsel %vm183_vm9, %v177_v35, %v194_v47 }
  0x3c   :  { %v188_v52 = vsel %vm182_vm8, %v185_v38, %v187_v45  ;;  %v196_v53 = vsel %vm182_vm8, %v193_v44, %v195_v51  ;;  %v762_v54 = vmul.u32.u64.low %v704_v23, %v192_v50  ;;  %v763_v55 = vmul.u32.u64.high %v704_v23, %v192_v50, %v762_v54 }
  0x3d   :  { %v766_v56 = vshrl.u32 %v107_v48, 30  ;;  %v769_v57 = vmul.u32.u64.low %v704_v23, %v196_v53  ;;  %v770_v58 = vmul.u32.u64.high %v704_v23, %v196_v53, %v769_v57  ;;  %v368_v59 = vadd.s32 1, %v537_v24 }
  0x3e   :  { %v204_v61 = vmul.u32 %v704_v23, %v188_v52  ;;  %v358_v62 = vand.u32 2147483647, %v700_v17  ;;  %v207_v49 = vadd.s32 1, %v763_v55  ;;  %v102_v27 = vadd.s32 %v736_v11, %v733_v10 }
  0x3f   :  { %v109_v60 = vshll.u32 %v766_v56, 30  ;;  %vm369_vm11 = vcmp.gt.s32.totalorder %v368_v59, 0  ;;  %vm206_vm12 = vc.u32 %v770_v58, %v762_v54  ;;  %vm48_vm3 = vcmp.lt.s32.totalorder %v680_v0, 0 }
  0x40   :  { %v370_v63 = vsel %vm369_vm11, %v368_v59, 0  ;;  %v208_v7 = vsel %vm206_vm12, %v207_v49, %v763_v55  ;;  %v365_v13 = vand.u32 8388607, %v358_v62  ;;  %vm825_vm4 = vcmp.le.f32.partialorder %v46_v2, 0.7853982 }
  0x41   :  { %v110_v3 = vsub.s32 %v106_v40, %v109_v60  ;;  %v372_v8 = vand.u32 31, %v370_v63  ;;  %v209_v12 = vadd.s32 %v208_v7, %v204_v61  ;;  %v371_v36 = vshrl.u32 %v370_v63, 5 }
  0x42   :  { %v366_v18 = vor.u32 8388608, %v365_v13  ;;  %vm151_vm6 = vcmp.lt.s32.totalorder %v687_v4, 0  ;;  %vm854_vm12 = vcmp.le.f32.partialorder %v149_v6, 0.7853982 }
  0x43   :  { %v112_v9 = vsub.s32 0, %v110_v3  ;;  %v373_v14 = vsub.s32 32, %v372_v8  ;;  %v210_v15 = vadd.s32 536870912, %v209_v12  ;;  %v375_v19 = vshll.u32 %v649_v26, %v372_v8 }
  0x44   :  { %v378_v25 = vshll.u32 %v650_v28, %v372_v8  ;;  %v384_v31 = vshll.u32 %v652_v32, %v372_v8  ;;  %v381_v37 = vshll.u32 %v651_v30, %v372_v8  ;;  %v795_v40 = vshll.u32 %v366_v18, 8 }
  0x45   :  { %v526_v23 = vmin.u32 %v112_v9, %v110_v3  ;;  %v376_v20 = vshrl.u32 %v650_v28, %v373_v14  ;;  %v783_v21 = vshrl.u32 %v210_v15, 30  ;;  %v379_v22 = vshrl.u32 %v651_v30, %v373_v14 }
  0x46   :  { %v385_v33 = vshrl.u32 %v653_v34, %v373_v14  ;;  %v382_v38 = vshrl.u32 %v652_v32, %v373_v14  ;;  %v387_v28 = vshll.u32 %v653_v34, %v372_v8  ;;  %v388_v43 = vshrl.u32 %v654_v41, %v373_v14 }
  0x47   :  { %v114_v16 = vclz %v526_v23  ;;  %v212_v35 = vshll.u32 %v783_v21, 30  ;;  %v377_v39 = vor.u32 %v376_v20, %v375_v19  ;;  %v380_v11 = vor.u32 %v379_v22, %v378_v25 }
  0x48   :  { %v386_v47 = vor.u32 %v385_v33, %v384_v31  ;;  %v374_v30 = vshrl.u32 %v649_v26, %v373_v14  ;;  %v383_v48 = vor.u32 %v382_v38, %v381_v37  ;;  %vm390_vm14 = vcmp.lt.s32.totalorder %v371_v36, 1 }
  0x49   :  { %v527_v29 = vadd.s32 4294967294, %v114_v16  ;;  %v213_v10 = vsub.s32 %v209_v12, %v212_v35  ;;  %vm391_vm15 = vcmp.lt.s32.totalorder %v371_v36, 2  ;;  %vm393_vm0 = vcmp.lt.s32.totalorder %v371_v36, 4 }
  0x4a   :  { %v389_v51 = vor.u32 %v388_v43, %v387_v28  ;;  %vm392_vm1 = vcmp.lt.s32.totalorder %v371_v36, 3  ;;  %v395_v52 = vsel %vm393_vm0, %v383_v48, 2102212464  ;;  %v398_v55 = vsel %vm390_vm14, %v377_v39, %v380_v11 }
  0x4b   :  { %vm528_vm13 = vcmp.lt.s32.totalorder %v527_v29, 0  ;;  %v215_v24 = vsub.s32 0, %v213_v10  ;;  %v399_v57 = vsel %vm393_vm0, %v386_v47, 920167782  ;;  %v394_v26 = vsel %vm390_vm14, %v374_v30, %v377_v39 }
  0x4c   :  { %v117_v42 = vsel %vm528_vm13, 0, %v527_v29  ;;  %v396_v49 = vsel %vm392_vm1, %v380_v11, %v395_v52  ;;  %v400_v63 = vsel %vm392_vm1, %v383_v48, %v399_v57  ;;  %v402_v8 = vsel %vm390_vm14, %v380_v11, %v383_v48 }
  0x4d   :  { %v118_v44 = vsub.s32 32, %v117_v42  ;;  %v119_v45 = vshll.u32 %v110_v3, %v117_v42  ;;  %v122_v46 = vsub.s32 4294967266, %v117_v42  ;;  %v530_v34 = vmin.u32 %v215_v24, %v213_v10 }
  0x4e   :  { %v401_v7 = vsel %vm391_vm15, %v398_v55, %v400_v63  ;;  %v403_v9 = vsel %vm393_vm0, %v389_v51, 1326507024  ;;  %v205_v15 = vadd.s32 %v762_v54, %v770_v58  ;;  %v397_v16 = vsel %vm391_vm15, %v394_v26, %v396_v49 }
  0x4f   :  { %v120_v32 = vshrl.u32 %v102_v27, %v118_v44  ;;  %v123_v50 = vadd.s32 127, %v122_v46  ;;  %v217_v59 = vclz %v530_v34  ;;  %v404_v13 = vsel %vm392_vm1, %v386_v47, %v403_v9 }
  0x50   :  { %v810_v14 = vmul.u32.u64.low %v795_v40, %v401_v7  ;;  %v811_v23 = vmul.u32.u64.high %v795_v40, %v401_v7, %v810_v14  ;;  %v405_v18 = vsel %vm391_vm15, %v402_v8, %v404_v13  ;;  %v413_v33 = vmul.u32 %v795_v40, %v397_v16 }
  0x51   :  { %v121_v53 = vor.u32 %v120_v32, %v119_v45  ;;  %v124_v41 = vshll.u32 %v123_v50, 23  ;;  %v531_v3 = vadd.s32 4294967294, %v217_v59  ;;  %v132_v36 = vsub.s32 4, %v766_v56 }
  0x52   :  { %v819_v25 = vmul.u32.u64.low %v795_v40, %v405_v18  ;;  %v820_v22 = vmul.u32.u64.high %v795_v40, %v405_v18, %v819_v25  ;;  %v416_v35 = vadd.s32 1, %v811_v23  ;;  %v467_v55 = vmul.f32 2.0, %v682_v1 }
  0x53   :  { %v125_v60 = vor.u32 4788187, %v124_v41  ;;  %v128_v61 = vcvt.s32.f32 %v121_v53  ;;  %vm532_vm2 = vcmp.lt.s32.totalorder %v531_v3, 0  ;;  %v133_v11 = vsel %vm48_vm3, %v132_v36, %v766_v56 }
  0x54   :  { %v220_v20 = vsel %vm532_vm2, 0, %v531_v3  ;;  %vm415_vm5 = vc.u32 %v820_v22, %v810_v14  ;;  %v135_v47 = vsel %vm825_vm4, 0, %v133_v11  ;;  %v476_v57 = vmul.f32 %v682_v1, %v682_v1 }
  0x55   :  { %v126_v12 = vand.u32 2147483647, %v125_v60  ;;  %v221_v27 = vsub.s32 32, %v220_v20  ;;  %v222_v29 = vshll.u32 %v213_v10, %v220_v20  ;;  %v225_v31 = vsub.s32 4294967266, %v220_v20 }
  0x56   :  { %v417_v40 = vsel %vm415_vm5, %v416_v35, %v811_v23  ;;  %v346_v30 = vadd.s32 3, %v135_v47  ;;  %v139_v51 = vand.u32 3, %v135_v47  ;;  %vm138_vm14 = vweird.f32 %v680_v0 }
  0x57   :  { %v129_v19 = vmul.f32 %v128_v61, %v126_v12  ;;  %v223_v37 = vshrl.u32 %v205_v15, %v221_v27  ;;  %v226_v38 = vadd.s32 127, %v225_v31  ;;  %v418_v10 = vadd.s32 %v417_v40, %v413_v33 }
  0x58   :  { %v347_v34 = vand.u32 3, %v346_v30  ;;  %vm144_vm8 = vcmp.eq.s32.totalorder %v139_v51, 2  ;;  %vm141_vm10 = vcmp.eq.s32.totalorder %v139_v51, 0  ;;  %vm140_vm13 = vcmp.lt.s32.totalorder %v139_v51, 2 }
  0x59   :  { %v130_v58 = vxor.u32 2147483648, %v129_v19  ;;  %v224_v28 = vor.u32 %v223_v37, %v222_v29  ;;  %v227_v42 = vshll.u32 %v226_v38, 23  ;;  %v419_v44 = vadd.s32 536870912, %v418_v10 }
  0x5a   :  { %vm352_vm7 = vcmp.eq.s32.totalorder %v347_v34, 2  ;;  %vm349_vm9 = vcmp.eq.s32.totalorder %v347_v34, 0  ;;  %vm348_vm11 = vcmp.lt.s32.totalorder %v347_v34, 2  ;;  %v414_v6 = vadd.s32 %v810_v14, %v820_v22 }
  0x5b   :  { %v131_v39 = vsel %vm48_vm3, %v130_v58, %v129_v19  ;;  %v228_v43 = vor.u32 4788187, %v227_v42  ;;  %v231_v46 = vcvt.s32.f32 %v224_v28  ;;  %v845_v24 = vshrl.u32 %v419_v44, 30 }
  0x5c   :  { %v134_v2 = vsel %vm825_vm4, %v680_v0, %v131_v39  ;;  %v468_v16 = vadd.f32 %v467_v55, %v689_v5  ;;  %v235_v31 = vsub.s32 4, %v783_v21  ;;  %vm360_vm0 = vcmp.lt.s32.totalorder %v700_v17, 0 }
  0x5d   :  { %565 = vcosq.f32 %v134_v2  ;;  %v229_v45 = vand.u32 2147483647, %v228_v43  ;;  %v421_v48 = vshll.u32 %v845_v24, 30  ;;  %v444_v44 = vsub.s32 4, %v845_v24 }
  0x5e   :  { %567 = vsinq.f32 %v134_v2  ;;  %v236_v37 = vsel %vm151_vm6, %v235_v31, %v783_v21  ;;  %vm888_vm1 = vcmp.le.f32.partialorder %v358_v62, 0.7853982  ;;  %vm241_vm5 = vweird.f32 %v687_v4 }
  0x5f   :  { %v232_v32 = vmul.f32 %v231_v46, %v229_v45  ;;  %v422_v50 = vsub.s32 %v418_v10, %v421_v48  ;;  %v238_v42 = vsel %vm854_vm12, 0, %v236_v37  ;;  %v445_v34 = vsel %vm360_vm0, %v444_v44, %v845_v24 }
  0x60   :  { %v242_v11 = vadd.s32 3, %v238_v42 }
  0x61   :  { %v424_v52 = vsub.s32 0, %v422_v50  ;;  %v233_v53 = vxor.u32 2147483648, %v232_v32 }
  0x63   :  { %v538_v56 = vmin.u32 %v424_v52, %v422_v50  ;;  %v234_v63 = vsel %vm151_vm6, %v233_v53, %v232_v32  ;;  %v243_v32 = vand.u32 3, %v242_v11 }
  0x64   :  { %v237_v23 = vsel %vm854_vm12, %v687_v4, %v234_v63 }
  0x65   :  { %v426_v60 = vclz %v538_v56  ;;  %569 = vcosq.f32 %v237_v23  ;;  %vm245_vm2 = vcmp.eq.s32.totalorder %v243_v32, 0  ;;  %vm248_vm3 = vcmp.eq.s32.totalorder %v243_v32, 2 }
  0x66   :  { %571 = vsinq.f32 %v237_v23  ;;  %v447_v56 = vsel %vm888_vm1, 0, %v445_v34  ;;  %vm244_vm4 = vcmp.lt.s32.totalorder %v243_v32, 2 }
  0x67   :  { %v539_v8 = vadd.s32 4294967294, %v426_v60 }
  0x69   :  { %vm540_vm15 = vcmp.lt.s32.totalorder %v539_v8, 0 }
  0x6a   :  { %v566_v41 = vpop.eup %565  ;;  %v429_v19 = vsel %vm540_vm15, 0, %v539_v8 }
  0x6b   :  { %v568_v59 = vpop.eup %567  ;;  %v145_v26 = vxor.u32 2147483648, %v566_v41  ;;  %v430_v27 = vsub.s32 32, %v429_v19  ;;  %v431_v29 = vshll.u32 %v422_v50, %v429_v19  ;;  %v434_v54 = vsub.s32 4294967266, %v429_v19 }
  0x6c   :  { %v142_v61 = vxor.u32 2147483648, %v568_v59 }
  0x6d   :  { %v354_v3 = vsel %vm352_vm7, %v145_v26, %v568_v59  ;;  %v146_v7 = vsel %vm144_vm8, %v145_v26, %v568_v59  ;;  %v432_v58 = vshrl.u32 %v414_v6, %v430_v27  ;;  %v435_v33 = vadd.s32 127, %v434_v54  ;;  %v45_v27 = vld [vmem:[#allocation5] sm:$0xff] }
  0x6e   :  { %v351_v9 = vsel %vm349_vm9, %v566_v41, %v142_v61  ;;  %v143_v12 = vsel %vm141_vm10, %v566_v41, %v142_v61  ;;  %v451_v59 = vadd.s32 3, %v447_v56  ;;  %vm450_vm9 = vweird.f32 %v700_v17 }
  0x6f   :  { %v355_v13 = vsel %vm348_vm11, %v351_v9, %v354_v3  ;;  %v147_v18 = vsel %vm140_vm13, %v143_v12, %v146_v7  ;;  %v433_v36 = vor.u32 %v432_v58, %v431_v29  ;;  %v436_v38 = vshll.u32 %v435_v33, 23 }
  0x70   :  { %v356_v15 = vsel %vm138_vm14, nan, %v355_v13  ;;  %v148_v22 = vsel %vm138_vm14, nan, %v147_v18  ;;  %v452_v60 = vand.u32 3, %v451_v59 }
  0x71   :  { %v869_v20 = vmul.f32 %v476_v57, %v356_v15  ;;  %v465_v25 = vsub.f32 0.0, %v356_v15  ;;  %v463_v39 = vmul.f32 2.0, %v148_v22  ;;  %v437_v2 = vor.u32 4788187, %v436_v38 }
  0x72   :  { %v440_v28 = vcvt.s32.f32 %v433_v36  ;;  %v880_v10 = vadd.f32 1.33, %v148_v22  ;;  %v570_v30 = vpop.eup %569  ;;  %vm457_vm6 = vcmp.eq.s32.totalorder %v452_v60, 2  ;;  %vm454_vm7 = vcmp.eq.s32.totalorder %v452_v60, 0 }
  0x73   :  { %v466_v14 = vmul.f32 %v465_v25, %v689_v5  ;;  %v438_v40 = vand.u32 2147483647, %v437_v2  ;;  %v882_v0 = vadd.f32 2.663, %v463_v39  ;;  %v572_v48 = vpop.eup %571  ;;  %v249_v53 = vxor.u32 2147483648, %v570_v30 }
  0x74   :  { %v484_v47 = vmul.f32 %v880_v10, %v880_v10  ;;  %v246_v52 = vxor.u32 2147483648, %v572_v48  ;;  %vm453_vm8 = vcmp.lt.s32.totalorder %v452_v60, 2  ;;  %v474_v15 = vmul.f32 0.1, %v682_v1 }
  0x75   :  { %v469_v35 = vmul.f32 %v468_v16, %v466_v14  ;;  %v441_v43 = vmul.f32 %v440_v28, %v438_v40  ;;  %v483_v46 = vmul.f32 1.33, %v882_v0  ;;  %v250_v57 = vsel %vm248_vm3, %v249_v53, %v572_v48 }
  0x76   :  { %v247_v55 = vsel %vm245_vm2, %v570_v30, %v246_v52  ;;  %v479_v16 = vmul.f32 0.1, %v689_v5  ;;  %v500_v54 = vsub.f32 0.0, %v880_v10 }
  0x77   :  { %v442_v45 = vxor.u32 2147483648, %v441_v43  ;;  %v485_v62 = vsub.f32 %v483_v46, %v484_v47  ;;  %v251_v24 = vsel %vm244_vm4, %v247_v55, %v250_v57 }
  0x78   :  { %v252_v61 = vsel %vm241_vm5, nan, %v251_v24 }
  0x79   :  { %v443_v50 = vsel %vm360_vm0, %v442_v45, %v441_v43  ;;  %v541_v41 = vadd.f32 -0.77289, %v485_v62  ;;  %v470_v7 = vmul.f32 14.715, %v252_v61 }
  0x7a   :  { %v446_v51 = vsel %vm888_vm1, %v700_v17, %v443_v50 }
  0x7b   :  { %573 = vcosq.f32 %v446_v51  ;;  %v487_v26 = vmax.f32 %v541_v41, 0.0  ;;  %v471_v23 = vadd.f32 %v470_v7, %v469_v35 }
  0x7c   :  { %575 = vsinq.f32 %v446_v51 }
  0x7d   :  { %v488_v49 = vadd.f32 0.77289, %v487_v26 }
  0x7f   :  { %577 = vrcp.f32 %v488_v49 }
  0x88   :  { %v574_v63 = vpop.eup %573 }
  0x89   :  { %v576_v3 = vpop.eup %575  ;;  %v458_v8 = vxor.u32 2147483648, %v574_v63 }
  0x8a   :  { %v455_v9 = vxor.u32 2147483648, %v576_v3 }
  0x8b   :  { %v459_v12 = vsel %vm457_vm6, %v458_v8, %v576_v3 }
  0x8c   :  { %v456_v13 = vsel %vm454_vm7, %v574_v63, %v455_v9  ;;  %v578_v1 = vpop.eup %577 }
  0x8d   :  { %v460_v4 = vsel %vm453_vm8, %v456_v13, %v459_v12 }
  0x8e   :  { %v461_v6 = vsel %vm450_vm9, nan, %v460_v4 }
  0x8f   :  { %v472_v18 = vmul.f32 9.81, %v461_v6 }
  0x91   :  { %v473_v19 = vadd.f32 %v472_v18, %v471_v23  ;;  %v478_v25 = vadd.f32 %v869_v20, %v472_v18 }
  0x93   :  { %v475_v29 = vadd.f32 %v474_v15, %v473_v19  ;;  %v480_v31 = vadd.f32 %v479_v16, %v478_v25 }
  0x95   :  { %v481_v17 = vsub.f32 0.0, %v475_v29  ;;  %v482_v14 = vsub.f32 %v45_v27, %v480_v31 }
  0x97   :  { %v494_v22 = vmul.f32 1.33, %v481_v17  ;;  %v495_v58 = vmul.f32 %v482_v14, %v880_v10  ;;  %v501_v33 = vmul.f32 %v500_v54, %v481_v17  ;;  %v502_v35 = vmul.f32 %v482_v14, %v882_v0 }
  0x99   :  { %v496_v5 = vsub.f32 %v494_v22, %v495_v58  ;;  %v503_v36 = vadd.f32 %v502_v35, %v501_v33 }
  0x9b   :  { %v497_v37 = vmul.f32 %v578_v1, %v496_v5  ;;  %v504_v20 = vmul.f32 %v578_v1, %v503_v36 }
  0x9d   :  { %499 = vst [vmem:[#allocation7 + $0x10] sm:$0xff] %v497_v37  ;;  %506 = vst [vmem:[#allocation7 + $0x18] sm:$0xff] %v504_v20 }
  0x9e   :  { %630 = shalt.err (!%p627_p0)
}
  0x9f   :  { %518 = dma.vmem_to_hbm [thread:$0]  %s513_s1, 512, %s917_s2, [#allocation4], %s646_s12, %s646_s12, %s647_s13  }
  0xa0   :  { %643 = dma.done.wait [#allocation4], 512  }
  0xa1   :  { %644 = vsyncadd [#allocation4], 4294966784 }
  0xa2   :  { %522 = vsyncpa [#allocation3], 1 }
  0xa3   :  { %523 = vsyncpa [#allocation6], 1 }
  0xa4   :  { %524 = vsyncpa [#allocation4], 1 }

</bundles_post_ra>
